<compile_context>
chip_gen: v5e
topology: v5e:2x2
jax: 0.10.0
libtpu: 0.0.40
codegen_flags: <defaults>
</compile_context>

<pallas_src>
import functools

import jax
import jax.numpy as jnp
import numpy as np
from jax.experimental import pallas as pl
from jax.experimental.pallas import tpu as pltpu


def _mloss_kernel(x_ref, y_ref, out_ref, *, thresh):
    # x_ref, y_ref: (5, T) tiles (features on sublanes, cells on lanes).
    # out_ref:      (1, 1, 128) f32 partial-sum block for this tile.
    conf_pred = x_ref[0:1, :].astype(jnp.float32)   # (1, T)
    conf_lab = y_ref[0:1, :].astype(jnp.float32)    # (1, T)
    box_pred = x_ref[1:5, :].astype(jnp.float32)    # (4, T)
    box_lab = y_ref[1:5, :].astype(jnp.float32)     # (4, T)

    face_mask = (conf_lab > thresh).astype(jnp.float32)      # (1, T)

    # --- MSE numerator over face cells (mean taken outside the kernel) ---
    sq = (box_pred - box_lab) ** 2                            # (4, T)
    sum_box = jnp.sum(sq * face_mask)

    # --- BCE terms (match torch.nn.BCELoss: log clamped at -100) ---
    log_p = jnp.maximum(jnp.log(conf_pred), -100.0)
    log_1mp = jnp.maximum(jnp.log(1.0 - conf_pred), -100.0)
    bce = -(conf_lab * log_p + (1.0 - conf_lab) * log_1mp)    # (1, T)
    sum_c = jnp.sum(bce * face_mask)

    # Background BCE against zero targets: -log(1 - p).
    # Padded lanes have conf_pred == 0 -> -log(1) == 0, so they contribute 0.
    sum_bg = jnp.sum((-log_1mp) * (1.0 - face_mask))

    face_cnt = jnp.sum(face_mask)

    # Pack the 4 scalars into the first 4 lanes of a (1, 1, 128) block.
    lane = jax.lax.broadcasted_iota(jnp.int32, (1, 1, 128), 2)
    stats = (jnp.where(lane == 0, face_cnt, 0.0)
             + jnp.where(lane == 1, sum_box, 0.0)
             + jnp.where(lane == 2, sum_c, 0.0)
             + jnp.where(lane == 3, sum_bg, 0.0))
    out_ref[...] = stats


def _round_up(a, b):
    return ((a + b - 1) // b) * b


@functools.partial(jax.jit, static_argnums=(2, 3, 4))
def _mloss_impl(x, y, thresh, alpha, tile_lanes):
    B, CN, C = x.shape
    Cy = y.shape[-1]
    N = B * CN

    # One fused XLA preprocessing pass: reshape + (optional) slice + transpose
    # + pad.  No dtype cast here — bf16 inputs stay bf16 in HBM and are
    # upcast per-tile inside the kernel.
    xf = x.reshape(N, C)
    yf = y.reshape(N, Cy)
    if C > 5:
        xf = xf[:, :5]
    if Cy > 5:
        yf = yf[:, :5]
    xt = xf.T                                   # (5, N) lane-dense
    yt = yf.T

    # Large lane tiles: per-grid-step overhead (~0.35 us) amortized over
    # >=32K elements.  For small N this collapses to a single grid step.
    # VMEM/step = 2 inputs * 2 buffers * ~8*tile*4B (~4 MiB at tile=32768),
    # comfortably inside v7x's 64 MiB / default 32 MiB scoped VMEM.
    tile = min(int(tile_lanes), _round_up(N, 128))
    tile = _round_up(tile, 128)
    num_tiles = pl.cdiv(N, tile)
    n_pad = num_tiles * tile - N
    xt = jnp.pad(xt, ((0, 0), (0, n_pad)))
    yt = jnp.pad(yt, ((0, 0), (0, n_pad)))

    partials = pl.pallas_call(
        functools.partial(_mloss_kernel, thresh=float(thresh)),
        out_shape=jax.ShapeDtypeStruct((num_tiles, 1, 128), jnp.float32),
        grid=(num_tiles,),
        in_specs=[
            pl.BlockSpec((5, tile), lambda i: (0, i)),
            pl.BlockSpec((5, tile), lambda i: (0, i)),
        ],
        out_specs=pl.BlockSpec((1, 1, 128), lambda i: (i, 0, 0)),
        compiler_params=pltpu.CompilerParams(
            dimension_semantics=("parallel",)),
    )(xt, yt)

    sums = jnp.sum(partials, axis=(0, 1))       # (128,)
    face_num = sums[0]
    sum_box, sum_c, sum_bg = sums[1], sums[2], sums[3]
    bg_num = jnp.float32(N) - face_num

    safe_face = jnp.maximum(face_num, 1.0)      # guard div-by-zero, exact if >0
    scale = 1.0 + 1.0 / safe_face
    loss = (scale * (sum_box / (safe_face * 4.0))
            + scale * (sum_c / safe_face)
            + alpha * (sum_bg / bg_num))

    # TODO(synk): PyTorch returns None when there are no face cells; to stay
    # jittable (no device->host sync) we return a NaN sentinel instead.
    return jnp.where(face_num > 0.0, loss, jnp.float32(jnp.nan))


def mloss_pallas(x, y, img_size=416, thresh=0.5, alpha=1.0, tile_lanes=32768):
    """x, y: (B, cell_num, >=5).  Returns scalar loss (NaN if no face cells)."""
    del img_size  # present only for signature parity with the PyTorch module
    return _mloss_impl(x, y, float(thresh), float(alpha), int(tile_lanes))


def mloss_ref(x, y, thresh=0.5, alpha=1.0):
    """Pure-JAX reference reproducing the PyTorch loop semantics."""
    B, CN, C = x.shape
    xf = x.reshape(-1, C).astype(jnp.float32)
    yf = y.reshape(-1, y.shape[-1]).astype(jnp.float32)
    mask = (yf[:, 0] > thresh).astype(jnp.float32)
    face_num = jnp.sum(mask)
    sq = (xf[:, 1:5] - yf[:, 1:5]) ** 2
    mse = jnp.sum(sq * mask[:, None]) / (face_num * 4.0)
    log_p = jnp.maximum(jnp.log(xf[:, 0]), -100.0)
    log_1mp = jnp.maximum(jnp.log(1.0 - xf[:, 0]), -100.0)
    bce = -(yf[:, 0] * log_p + (1.0 - yf[:, 0]) * log_1mp)
    bce_c = jnp.sum(bce * mask) / face_num
    bg_bce = jnp.sum((-log_1mp) * (1.0 - mask)) / jnp.sum(1.0 - mask)
    return (1.0 + 1.0 / face_num) * mse + (1.0 + 1.0 / face_num) * bce_c \
        + alpha * bg_bce


if __name__ == "__main__":
    key = jax.random.PRNGKey(0)
    B, CELLS, FEAT = 2, 169, 5          # 13x13 grid per image (img_size=416)

    k1, k2, k3 = jax.random.split(key, 3)
    # Predictions: confidences / boxes squashed into (0, 1) like sigmoid outputs.
    x = jax.nn.sigmoid(jax.random.normal(k1, (B, CELLS, FEAT), jnp.float32))
    # Labels: ~20% face cells (conf=1), boxes uniform in (0, 1).
    face = (jax.random.uniform(k2, (B, CELLS, 1)) < 0.2).astype(jnp.float32)
    boxes = jax.random.uniform(k3, (B, CELLS, 4), jnp.float32)
    y = jnp.concatenate([face, boxes], axis=-1)

    loss = jax.block_until_ready(mloss_pallas(x, y))
    ref = jax.block_until_ready(mloss_ref(x, y))
    np.testing.assert_allclose(np.asarray(loss), np.asarray(ref),
                               rtol=1e-5, atol=1e-5)
    print("KERNEL_OK")
</pallas_src>

<mosaic_0001>
module attributes {stable_mosaic.version = 11 : i64} {
  func.func @_mloss_kernel(%arg0: i32, %arg1: memref<5x384xf32, #tpu.memory_space<vmem>>, %arg2: memref<5x384xf32, #tpu.memory_space<vmem>>, %arg3: memref<1x1x128xf32, #tpu.memory_space<vmem>>) attributes {dimension_semantics = [#tpu.dimension_semantics<parallel>], iteration_bounds = array<i64: 1>, scalar_prefetch = 0 : i64, scratch_operands = 0 : i64, tpu.core_type = #tpu.core_type<tc>, window_params = [{transform_indices = @transform_0, window_bounds = array<i64: 5, 384>}, {transform_indices = @transform_1, window_bounds = array<i64: 5, 384>}, {transform_indices = @transform_2, window_bounds = array<i64: 1, 1, 128>}]} {
    %c0 = arith.constant 0 : index
    %c0_0 = arith.constant 0 : index
    %0 = vector.load %arg1[%c0, %c0_0] : memref<5x384xf32, #tpu.memory_space<vmem>>, vector<1x384xf32>
    %c0_1 = arith.constant 0 : index
    %c0_2 = arith.constant 0 : index
    %1 = vector.load %arg2[%c0_1, %c0_2] : memref<5x384xf32, #tpu.memory_space<vmem>>, vector<1x384xf32>
    %c1 = arith.constant 1 : index
    %c0_3 = arith.constant 0 : index
    %2 = vector.load %arg1[%c1, %c0_3] : memref<5x384xf32, #tpu.memory_space<vmem>>, vector<4x384xf32>
    %c1_4 = arith.constant 1 : index
    %c0_5 = arith.constant 0 : index
    %3 = vector.load %arg2[%c1_4, %c0_5] : memref<5x384xf32, #tpu.memory_space<vmem>>, vector<4x384xf32>
    %cst = arith.constant 5.000000e-01 : f32
    %4 = vector.broadcast %cst : f32 to vector<1x384xf32>
    %5 = arith.cmpf ogt, %1, %4 : vector<1x384xf32>
    %6 = arith.extui %5 : vector<1x384xi1> to vector<1x384xi32>
    %7 = arith.sitofp %6 : vector<1x384xi32> to vector<1x384xf32>
    %8 = arith.subf %2, %3 : vector<4x384xf32>
    %9 = arith.mulf %8, %8 : vector<4x384xf32>
    %10 = vector.broadcast %7 : vector<1x384xf32> to vector<4x384xf32>
    %11 = arith.mulf %9, %10 : vector<4x384xf32>
    %12 = vector.shape_cast %11 : vector<4x384xf32> to vector<1x4x384xf32>
    %cst_6 = arith.constant dense<0.000000e+00> : vector<1xf32>
    %13 = vector.multi_reduction <add>, %12, %cst_6 [1, 2] : vector<1x4x384xf32> to vector<1xf32>
    %14 = vector.shape_cast %13 : vector<1xf32> to vector<1x1x1xf32>
    %15 = vector.extract %14[0, 0, 0] : f32 from vector<1x1x1xf32>
    %16 = math.log %0 : vector<1x384xf32>
    %cst_7 = arith.constant -1.000000e+02 : f32
    %17 = vector.broadcast %cst_7 : f32 to vector<1x384xf32>
    %18 = arith.maximumf %16, %17 : vector<1x384xf32>
    %cst_8 = arith.constant 1.000000e+00 : f32
    %19 = vector.broadcast %cst_8 : f32 to vector<1x384xf32>
    %20 = arith.subf %19, %0 : vector<1x384xf32>
    %21 = math.log %20 : vector<1x384xf32>
    %cst_9 = arith.constant -1.000000e+02 : f32
    %22 = vector.broadcast %cst_9 : f32 to vector<1x384xf32>
    %23 = arith.maximumf %21, %22 : vector<1x384xf32>
    %24 = arith.mulf %1, %18 : vector<1x384xf32>
    %cst_10 = arith.constant 1.000000e+00 : f32
    %25 = vector.broadcast %cst_10 : f32 to vector<1x384xf32>
    %26 = arith.subf %25, %1 : vector<1x384xf32>
    %27 = arith.mulf %26, %23 : vector<1x384xf32>
    %28 = arith.addf %24, %27 : vector<1x384xf32>
    %cst_11 = arith.constant 0.000000e+00 : f32
    %29 = vector.broadcast %cst_11 : f32 to vector<1x384xf32>
    %30 = arith.subf %29, %28 : vector<1x384xf32>
    %31 = arith.mulf %30, %7 : vector<1x384xf32>
    %32 = vector.shape_cast %31 : vector<1x384xf32> to vector<1x1x384xf32>
    %cst_12 = arith.constant dense<0.000000e+00> : vector<1xf32>
    %33 = vector.multi_reduction <add>, %32, %cst_12 [1, 2] : vector<1x1x384xf32> to vector<1xf32>
    %34 = vector.shape_cast %33 : vector<1xf32> to vector<1x1x1xf32>
    %35 = vector.extract %34[0, 0, 0] : f32 from vector<1x1x1xf32>
    %cst_13 = arith.constant 0.000000e+00 : f32
    %36 = vector.broadcast %cst_13 : f32 to vector<1x384xf32>
    %37 = arith.subf %36, %23 : vector<1x384xf32>
    %cst_14 = arith.constant 1.000000e+00 : f32
    %38 = vector.broadcast %cst_14 : f32 to vector<1x384xf32>
    %39 = arith.subf %38, %7 : vector<1x384xf32>
    %40 = arith.mulf %37, %39 : vector<1x384xf32>
    %41 = vector.shape_cast %40 : vector<1x384xf32> to vector<1x1x384xf32>
    %cst_15 = arith.constant dense<0.000000e+00> : vector<1xf32>
    %42 = vector.multi_reduction <add>, %41, %cst_15 [1, 2] : vector<1x1x384xf32> to vector<1xf32>
    %43 = vector.shape_cast %42 : vector<1xf32> to vector<1x1x1xf32>
    %44 = vector.extract %43[0, 0, 0] : f32 from vector<1x1x1xf32>
    %45 = vector.shape_cast %7 : vector<1x384xf32> to vector<1x1x384xf32>
    %cst_16 = arith.constant dense<0.000000e+00> : vector<1xf32>
    %46 = vector.multi_reduction <add>, %45, %cst_16 [1, 2] : vector<1x1x384xf32> to vector<1xf32>
    %47 = vector.shape_cast %46 : vector<1xf32> to vector<1x1x1xf32>
    %48 = vector.extract %47[0, 0, 0] : f32 from vector<1x1x1xf32>
    %49 = tpu.iota {dimensions = array<i32: 2>} : vector<1x1x128xi32>
    %c0_i32 = arith.constant 0 : i32
    %50 = vector.broadcast %c0_i32 : i32 to vector<1x1x128xi32>
    %51 = arith.cmpi eq, %49, %50 : vector<1x1x128xi32>
    %cst_17 = arith.constant 0.000000e+00 : f32
    %52 = vector.broadcast %48 : f32 to vector<1x1x128xf32>
    %53 = vector.broadcast %cst_17 : f32 to vector<1x1x128xf32>
    %54 = arith.select %51, %52, %53 : vector<1x1x128xi1>, vector<1x1x128xf32>
    %c1_i32 = arith.constant 1 : i32
    %55 = vector.broadcast %c1_i32 : i32 to vector<1x1x128xi32>
    %56 = arith.cmpi eq, %49, %55 : vector<1x1x128xi32>
    %cst_18 = arith.constant 0.000000e+00 : f32
    %57 = vector.broadcast %15 : f32 to vector<1x1x128xf32>
    %58 = vector.broadcast %cst_18 : f32 to vector<1x1x128xf32>
    %59 = arith.select %56, %57, %58 : vector<1x1x128xi1>, vector<1x1x128xf32>
    %60 = arith.addf %54, %59 : vector<1x1x128xf32>
    %c2_i32 = arith.constant 2 : i32
    %61 = vector.broadcast %c2_i32 : i32 to vector<1x1x128xi32>
    %62 = arith.cmpi eq, %49, %61 : vector<1x1x128xi32>
    %cst_19 = arith.constant 0.000000e+00 : f32
    %63 = vector.broadcast %35 : f32 to vector<1x1x128xf32>
    %64 = vector.broadcast %cst_19 : f32 to vector<1x1x128xf32>
    %65 = arith.select %62, %63, %64 : vector<1x1x128xi1>, vector<1x1x128xf32>
    %66 = arith.addf %60, %65 : vector<1x1x128xf32>
    %c3_i32 = arith.constant 3 : i32
    %67 = vector.broadcast %c3_i32 : i32 to vector<1x1x128xi32>
    %68 = arith.cmpi eq, %49, %67 : vector<1x1x128xi32>
    %cst_20 = arith.constant 0.000000e+00 : f32
    %69 = vector.broadcast %44 : f32 to vector<1x1x128xf32>
    %70 = vector.broadcast %cst_20 : f32 to vector<1x1x128xf32>
    %71 = arith.select %68, %69, %70 : vector<1x1x128xi1>, vector<1x1x128xf32>
    %72 = arith.addf %66, %71 : vector<1x1x128xf32>
    %c0_21 = arith.constant 0 : index
    %c0_22 = arith.constant 0 : index
    %c0_23 = arith.constant 0 : index
    %73 = vector.load %arg3[%c0_21, %c0_22, %c0_23] : memref<1x1x128xf32, #tpu.memory_space<vmem>>, vector<1x1x128xf32>
    tpu.vector_store %arg3[%c0_21, %c0_22, %c0_23], %72 {strides = array<i32>} : memref<1x1x128xf32, #tpu.memory_space<vmem>>, vector<1x1x128xf32>,
    return
  }
  func.func @transform_0(%arg0: i32) -> (i32, i32) {
    %c0_i32 = arith.constant 0 : i32
    %c0_i32_0 = arith.constant 0 : i32
    return %c0_i32, %arg0 : i32, i32
  }
  func.func @transform_1(%arg0: i32) -> (i32, i32) {
    %c0_i32 = arith.constant 0 : i32
    %c0_i32_0 = arith.constant 0 : i32
    return %c0_i32, %arg0 : i32, i32
  }
  func.func @transform_2(%arg0: i32) -> (i32, i32, i32) {
    %c0_i32 = arith.constant 0 : i32
    %c0_i32_0 = arith.constant 0 : i32
    %c0_i32_1 = arith.constant 0 : i32
    return %arg0, %c0_i32, %c0_i32_0 : i32, i32, i32
  }
}

</mosaic_0001>

<bundles_post_ra>
// kernel: _mloss_impl.1
= control target key start
LH: loop header
LB: loop body
LE: loop exit
PB: predicated region body
PF: predicated region fallthrough
CT: control target
= control target key end

     0   :  { %v171_v8 = vmov 0.0   ;;  %vm47_vm1 = vcmask 1043456   ;;  %vm82_vm2 = vcmask 1040384   ;;  %s223_s0 = inlined_call_operand.vmem [shape: f32[5,384], index: 0, kind: input, shape index: {}]   ;;  %s224_s1 = inlined_call_operand.vmem [shape: f32[5,384], index: 1, kind: input, shape index: {}]   ;;  %s225_s2 = inlined_call_operand.vmem [shape: f32[1,1,128], index: 2, kind: output, shape index: {}]  }
   0x1   :  { %v12_v0 = vld [vmem:[%s224_s1] ss:$8 sm:$0x7]  ;;  %v13_v1 = vld [vmem:[%s223_s0] sm:$0x1e] }
   0x2   :  { %v14_v2 = vld [vmem:[%s223_s0 + $0x8] sm:$0x1e]  ;;  %v15_v3 = vld [vmem:[%s223_s0 + $0x10] sm:$0x1e]  ;;  %v16_v4 = vld [vmem:[%s224_s1] sm:$0x1e] }
   0x3   :  { %v17_v5 = vld [vmem:[%s224_s1 + $0x8] sm:$0x1e]  ;;  %v18_v6 = vld [vmem:[%s224_s1 + $0x10] sm:$0x1e]  ;;  %vm19_vm0 = vcmp.gt.f32.partialorder %v12_v0, 0.5  ;;  %v22_v7 = vsub.f32 %v13_v1, %v16_v4  ;;  %v70_v36 = vsub.f32 1.0, %v12_v0 }
   0x4   :  { %v157_v9 = vsel %vm19_vm0, 1.0, %v171_v8  ;;  %v23_v10 = vsub.f32 %v14_v2, %v17_v5  ;;  %v24_v11 = vsub.f32 %v15_v3, %v18_v6  ;;  %v11_v12 = vld [vmem:[%s223_s0] ss:$8 sm:$0x7] }
   0x5   :  { %v25_v13 = vmul.f32 %v22_v7, %v22_v7  ;;  %v29_v14 = vperm.slane %v157_v9, 0  ;;  %v30_v15 = vperm.slane %v157_v9, 1  ;;  %v31_v16 = vperm.slane %v157_v9, 2 }
   0x6   :  { %v26_v17 = vmul.f32 %v23_v10, %v23_v10  ;;  %v27_v18 = vmul.f32 %v24_v11, %v24_v11  ;;  %167 = vlog2.f32 %v11_v12  ;;  %v65_v19 = vsub.f32 1.0, %v11_v12 }
   0x7   :  { %v35_v20 = vmul.f32 %v29_v14, %v25_v13  ;;  %v98_v38 = vsub.f32 1.0, %v157_v9  ;;  %v121_v53 = vsel %vm82_vm2, %v29_v14, 0.0  ;;  %v122_v57 = vsel %vm82_vm2, %v30_v15, 0.0 }
   0x8   :  { %v36_v21 = vmul.f32 %v30_v15, %v26_v17  ;;  %v37_v22 = vmul.f32 %v31_v16, %v27_v18  ;;  %169 = vlog2.f32 %v65_v19  ;;  %v123_v63 = vadd.f32 %v122_v57, %v121_v53 }
   0x9   :  { %v41_v23 = vrot.slane %v35_v20, 1 }
   0xa   :  { %v42_v24 = vrot.slane %v36_v21, 1  ;;  %v43_v25 = vrot.slane %v37_v22, 1 }
   0xb   :  { %v48_v26 = vsel %vm47_vm1, %v41_v23, 0.0 }
   0xc   :  { %v168_v27 = vpop.eup %167  ;;  %v49_v28 = vsel %vm47_vm1, %v42_v24, 0.0  ;;  %v51_v29 = vsel %vm47_vm1, %v43_v25, 0.0 }
   0xd   :  { %v50_v30 = vadd.f32 %v49_v28, %v48_v26  ;;  %v63_v31 = vmul.f32 0.6931472, %v168_v27 }
   0xe   :  { %v170_v32 = vpop.eup %169 }
   0xf   :  { %v52_v33 = vadd.f32 %v51_v29, %v50_v30  ;;  %v67_v34 = vmul.f32 0.6931472, %v170_v32  ;;  %v64_v35 = vmax.f32 %v63_v31, -100.0  ;;  %v135_v31 = vlaneseq }
  0x11   :  { %53 = vadd.xlane.f32.xlu0 %v52_v33  ;;  %v68_v37 = vmax.f32 %v67_v34, -100.0  ;;  %v69_v39 = vmul.f32 %v64_v35, %v12_v0  ;;  %v124_v0 = vsel %vm82_vm2, %v31_v16, 0.0  ;;  %v136_v32 = vand.u32 127, %v135_v31 }
  0x12   :  { %v125_v2 = vadd.f32 %v124_v0, %v123_v63 }
  0x13   :  { %v97_v40 = vsub.f32 0.0, %v68_v37  ;;  %v71_v41 = vmul.f32 %v70_v36, %v68_v37  ;;  %vm140_vm3 = vcmp.eq.s32.totalorder %v136_v32, 1  ;;  %vm137_vm4 = vcmp.eq.s32.totalorder %v136_v32, 0 }
  0x14   :  { %vm144_vm5 = vcmp.eq.s32.totalorder %v136_v32, 2  ;;  %vm148_vm6 = vcmp.eq.s32.totalorder %v136_v32, 3 }
  0x15   :  { %v99_v42 = vmul.f32 %v98_v38, %v97_v40  ;;  %v72_v43 = vadd.f32 %v71_v41, %v69_v39 }
  0x17   :  { %v101_v44 = vperm.slane %v99_v42, 0  ;;  %v102_v45 = vperm.slane %v99_v42, 1  ;;  %v103_v46 = vperm.slane %v99_v42, 2  ;;  %v73_v47 = vsub.f32 0.0, %v72_v43 }
  0x19   :  { %v107_v48 = vsel %vm82_vm2, %v101_v44, 0.0  ;;  %v108_v49 = vsel %vm82_vm2, %v102_v45, 0.0  ;;  %v110_v50 = vsel %vm82_vm2, %v103_v46, 0.0  ;;  %v74_v51 = vmul.f32 %v157_v9, %v73_v47 }
  0x1a   :  { %v109_v52 = vadd.f32 %v108_v49, %v107_v48 }
  0x1b   :  { %v76_v54 = vperm.slane %v74_v51, 0  ;;  %v77_v55 = vperm.slane %v74_v51, 1  ;;  %v78_v56 = vperm.slane %v74_v51, 2 }
  0x1c   :  { %v111_v58 = vadd.f32 %v110_v50, %v109_v52 }
  0x1d   :  { %v83_v59 = vsel %vm82_vm2, %v76_v54, 0.0  ;;  %v84_v60 = vsel %vm82_vm2, %v77_v55, 0.0  ;;  %v86_v61 = vsel %vm82_vm2, %v78_v56, 0.0 }
  0x1e   :  { %112 = vadd.xlane.f32.xlu1 %v111_v58  ;;  %v85_v62 = vadd.f32 %v84_v60, %v83_v59 }
  0x20   :  { %v87_v1 = vadd.f32 %v86_v61, %v85_v62 }
  0x22   :  { %88 = vadd.xlane.f32.xlu0 %v87_v1 }
  0x26   :  { %126 = vadd.xlane.f32.xlu1 %v125_v2 }
  0x84   :  { %v54_v3 = vpop.xlane.xlu0 %53 }
  0x85   :  { %v55_v4 = vrot.slane %v54_v3, 4 }
  0x87   :  { %v56_v5 = vadd.f32 %v55_v4, %v54_v3 }
  0x89   :  { %v57_v6 = vrot.slane %v56_v5, 2 }
  0x8b   :  { %v58_v7 = vadd.f32 %v57_v6, %v56_v5 }
  0x8d   :  { %v59_v8 = vrot.slane %v58_v7, 1 }
  0x8f   :  { %v60_v9 = vadd.f32 %v59_v8, %v58_v7 }
  0x91   :  { %v113_v10 = vpop.xlane.xlu1 %112  ;;  %158 = vpush %v60_v9 }
  0x92   :  { %v114_v11 = vrot.slane %v113_v10, 4 }
  0x94   :  { %v115_v12 = vadd.f32 %v114_v11, %v113_v10 }
  0x95   :  { %v89_v13 = vpop.xlane.xlu0 %88 }
  0x96   :  { %v116_v14 = vrot.slane %v115_v12, 2  ;;  %v90_v15 = vrot.slane %v89_v13, 4 }
  0x98   :  { %v91_v17 = vadd.f32 %v90_v15, %v89_v13  ;;  %v117_v18 = vadd.f32 %v116_v14, %v115_v12 }
  0x99   :  { %v127_v16 = vpop.xlane.xlu1 %126 }
  0x9a   :  { %v92_v19 = vrot.slane %v91_v17, 2  ;;  %v128_v20 = vrot.slane %v127_v16, 4  ;;  %v118_v23 = vrot.slane %v117_v18, 1 }
  0x9c   :  { %v93_v21 = vadd.f32 %v92_v19, %v91_v17  ;;  %v129_v22 = vadd.f32 %v128_v20, %v127_v16  ;;  %v119_v28 = vadd.f32 %v118_v23, %v117_v18 }
  0x9e   :  { %v130_v24 = vrot.slane %v129_v22, 2  ;;  %v94_v25 = vrot.slane %v93_v21, 1 }
  0xa0   :  { %v131_v26 = vadd.f32 %v130_v24, %v129_v22  ;;  %v95_v27 = vadd.f32 %v94_v25, %v93_v21 }
  0xa2   :  { %160 = vpush %v95_v27  ;;  %v132_v29 = vrot.slane %v131_v26, 1 }
  0xa3   :  { %162 = vpush %v119_v28 }
  0xa4   :  { %v133_v30 = vadd.f32 %v132_v29, %v131_v26 }
  0xa6   :  { %164 = vpush %v133_v30 }
  0xc2   :  { %s159_s0 = spop %158 }
  0xc3   :  { %v141_v33 = vstv %s159_s0 }
  0xc4   :  { %v142_v36 = vsel %vm140_vm3, %v141_v33, 0.0 }
  0xd3   :  { %s161_s1 = spop %160 }
  0xd4   :  { %s163_s25 = spop %162  ;;  %v145_v34 = vstv %s161_s1 }
  0xd5   :  { %v149_v38 = vstv %s163_s25  ;;  %v146_v40 = vsel %vm144_vm5, %v145_v34, 0.0 }
  0xd6   :  { %v150_v42 = vsel %vm148_vm6, %v149_v38, 0.0 }
  0xd7   :  { %s165_s26 = spop %164 }
  0xd8   :  { %v138_v35 = vstv %s165_s26 }
  0xd9   :  { %v139_v37 = vsel %vm137_vm4, %v138_v35, 0.0 }
  0xda   :  { %v143_v39 = vadd.f32 %v142_v36, %v139_v37 }
  0xdc   :  { %v147_v41 = vadd.f32 %v146_v40, %v143_v39 }
  0xde   :  { %v151_v43 = vadd.f32 %v150_v42, %v147_v41 }
  0xe0   :  { %152 = vst [vmem:[%s225_s2] sm:$0x1] %v151_v43 }

</bundles_post_ra>
